<compile_context>
chip_gen: v5e
topology: v5e:2x2
jax: 0.10.0
libtpu: 0.0.40
codegen_flags: <defaults>
</compile_context>

<pallas_src>
import math

import jax
import jax.numpy as jnp
from jax import lax
from jax.experimental import pallas as pl
from jax.experimental.pallas import tpu as pltpu


_INV_SQRT2 = 1.0 / math.sqrt(2.0)


def _ffn_kernel(x_ref, w1_ref, b1_ref, w2_ref, b2_ref, o_ref, acc_ref):
    # Grid: (i over M tiles [parallel], k over hidden tiles [reduction]).
    #   x_ref:  (tile_m, dim)   native dtype   w1_ref: (dim, tile_h)
    #   b1_ref: (1, tile_h)                     w2_ref: (tile_h, dim)
    #   b2_ref: (1, dim)                        o_ref:  (tile_m, dim)
    #   acc_ref: f32 VMEM scratch (tile_m, dim), persists across k.
    k = pl.program_id(1)

    # First linear (hidden-tile slice): h = x @ W1[:, k] + b1[k].
    # Operands stay in native dtype (bf16 -> full-rate MXU), f32 accumulation.
    h = jnp.dot(x_ref[...], w1_ref[...], preferred_element_type=jnp.float32)
    h = h + b1_ref[...].astype(jnp.float32)

    # Exact (erf-based) GELU, matching torch.nn.GELU() default.  Kept in f32
    # (v5e VPU/EUP have no bf16); erf runs on the EUP, hidden under the MXU.
    g = 0.5 * h * (1.0 + lax.erf(h * _INV_SQRT2))

    # Second linear partial sum for this hidden tile.
    partial = jnp.dot(
        g.astype(w2_ref.dtype), w2_ref[...], preferred_element_type=jnp.float32
    )

    # k == 0: direct store (saves a zero-fill + RMW pass over the accumulator).
    @pl.when(k == 0)
    def _():
        acc_ref[...] = partial

    @pl.when(k > 0)
    def _():
        acc_ref[...] += partial

    @pl.when(k == pl.num_programs(1) - 1)
    def _():
        y = acc_ref[...] + b2_ref[...].astype(jnp.float32)
        o_ref[...] = y.astype(o_ref.dtype)


def _round_up(x, m):
    return ((x + m - 1) // m) * m


def _sublane_multiple(dtype):
    # 8 rows per sublane-tile for 32-bit, 16 for bf16, 32 for int8/fp8.
    return max(8, 32 // jnp.dtype(dtype).itemsize)


def _vmem_limit_bytes():
    """Per-generation VMEM limit with headroom for Mosaic internal scratch."""
    cap = None
    try:
        cap = getattr(pltpu.get_tpu_info(), "vmem_capacity_bytes", None)
    except Exception:
        cap = None
    if cap is None:
        try:
            kind = jax.devices()[0].device_kind.lower()
        except Exception:
            kind = ""
        if ("v5" in kind) or ("v6" in kind):
            cap = 128 * 1024 * 1024
        else:
            cap = 64 * 1024 * 1024  # conservative (v7x per-TC)
    cap = int(cap)
    if cap >= 96 * 1024 * 1024:
        # v5e / v6e: 128 MiB physical -> use ~110 MiB.
        return min(cap - 16 * 1024 * 1024, 112 * 1024 * 1024)
    # v7x: 64 MiB per TC -> leave ~10 MiB headroom.
    return max(cap - 10 * 1024 * 1024, 32 * 1024 * 1024)


def _tile_h_candidates(hidden):
    """Multiples of 128 dividing hidden, capped at 1024; prefer >= 512."""
    cands = [t for t in range(128, min(hidden, 1024) + 1, 128) if hidden % t == 0]
    big = [t for t in cands if t >= 512]
    if big:
        return sorted(big, reverse=True)
    if cands:
        return sorted(cands, reverse=True)
    return [hidden]  # block == full array dim is always legal


def _select_tiles(M, dim, hidden, xbytes, wbytes, budget, sub_m):
    """Budget-driven (tile_m, tile_h): spend leftover VMEM on tile_m."""
    tm_cap = min(1024, _round_up(max(M, 1), sub_m))
    best = None
    for th in _tile_h_candidates(hidden):
        # Double-buffered weight / bias tiles at this tile_h.
        w_foot = (2 * dim * th + 2 * th * dim + 2 * th + 2 * dim) * wbytes
        # Per-row-of-M cost: x dbuf + out dbuf + f32 acc + partial + f32 h/g.
        per_m = 4 * dim * xbytes + 2 * dim * 4 + 2 * th * 4
        avail = budget - w_foot
        if avail <= 0:
            continue
        tm = int(avail // per_m)
        tm = min(tm, tm_cap)
        tm = (tm // sub_m) * sub_m
        if tm < sub_m:
            continue
        cand = (tm, th)  # maximize tile_m first, then tile_h
        if best is None or cand > best:
            best = cand
    if best is None:
        return sub_m, _tile_h_candidates(hidden)[-1]
    return best


def feed_forward(x, w1, b1, w2, b2, *, tile_m=None, tile_h=None):
    """x: (..., dim); w1: (dim, hidden); b1: (hidden,); w2: (hidden, dim); b2: (dim,)."""
    orig_shape = x.shape
    dim = orig_shape[-1]
    hidden = w1.shape[1]
    x_flat = x.reshape(-1, dim)
    M = x_flat.shape[0]

    xbytes = jnp.dtype(x.dtype).itemsize
    wbytes = jnp.dtype(w1.dtype).itemsize
    sub_m = _sublane_multiple(x.dtype)

    # --- VMEM budget & tile selection ------------------------------------
    vmem_limit = _vmem_limit_bytes()
    budget = int(vmem_limit * 0.85)  # slack for Mosaic internals / temporaries

    auto_tm, auto_th = _select_tiles(M, dim, hidden, xbytes, wbytes, budget, sub_m)
    if tile_m is None:
        tile_m = auto_tm
    if tile_h is None:
        tile_h = auto_th
    tile_m = max(sub_m, _round_up(int(tile_m), sub_m))
    assert hidden % tile_h == 0, "tile_h must divide hidden"

    M_pad = _round_up(M, tile_m)
    if M_pad != M:
        x_flat = jnp.pad(x_flat, ((0, M_pad - M), (0, 0)))

    b1_2d = b1.reshape(1, hidden)
    b2_2d = b2.reshape(1, dim)

    m_tiles = M_pad // tile_m
    grid = (m_tiles, hidden // tile_h)

    # --- cost hint (includes weight re-streaming once per M tile) --------
    cost = pl.CostEstimate(
        flops=int(4 * M_pad * dim * hidden),
        transcendentals=int(M_pad * hidden),
        bytes_accessed=int(
            2 * M_pad * dim * xbytes
            + m_tiles * (w1.size + w2.size + b1.size + b2.size) * wbytes
        ),
    )

    out_flat = pl.pallas_call(
        _ffn_kernel,
        out_shape=jax.ShapeDtypeStruct((M_pad, dim), x.dtype),
        grid_spec=pltpu.PrefetchScalarGridSpec(
            num_scalar_prefetch=0,
            grid=grid,
            in_specs=[
                pl.BlockSpec((tile_m, dim), lambda i, k: (i, 0)),   # x tile
                pl.BlockSpec((dim, tile_h), lambda i, k: (0, k)),   # W1 tile
                pl.BlockSpec((1, tile_h), lambda i, k: (0, k)),     # b1 tile
                pl.BlockSpec((tile_h, dim), lambda i, k: (k, 0)),   # W2 tile
                pl.BlockSpec((1, dim), lambda i, k: (0, 0)),        # b2
            ],
            out_specs=pl.BlockSpec((tile_m, dim), lambda i, k: (i, 0)),
            scratch_shapes=[pltpu.VMEM((tile_m, dim), jnp.float32)],
        ),
        compiler_params=pltpu.CompilerParams(
            dimension_semantics=("parallel", "arbitrary"),
            vmem_limit_bytes=int(vmem_limit),
        ),
        cost_estimate=cost,
    )(x_flat, w1, b1_2d, w2, b2_2d)

    if M_pad != M:
        out_flat = out_flat[:M]
    return out_flat.reshape(orig_shape)


def init_feed_forward_params(key, dim, hidden_dim, dtype=jnp.float32):
    """Deterministic synthetic init mimicking nn.Linear's uniform(-1/sqrt(fan_in), ...)."""
    k1, k2, k3, k4 = jax.random.split(key, 4)
    bound1 = 1.0 / math.sqrt(dim)
    bound2 = 1.0 / math.sqrt(hidden_dim)
    # Stored already transposed: (in_features, out_features)
    w1 = jax.random.uniform(k1, (dim, hidden_dim), dtype, -bound1, bound1)
    b1 = jax.random.uniform(k2, (hidden_dim,), dtype, -bound1, bound1)
    w2 = jax.random.uniform(k3, (hidden_dim, dim), dtype, -bound2, bound2)
    b2 = jax.random.uniform(k4, (dim,), dtype, -bound2, bound2)
    return w1, b1, w2, b2


def feed_forward_ref(x, w1, b1, w2, b2):
    """Pure-JAX reference (same math as the PyTorch module in eval / p=0)."""
    h = x @ w1 + b1
    g = jax.nn.gelu(h, approximate=False)
    return g @ w2 + b2


if __name__ == "__main__":
    key = jax.random.PRNGKey(0)
    # Small shapes; seq=7 deliberately exercises the ragged-M pad/slice path.
    batch, seq, dim, hidden_dim = 2, 7, 32, 64

    kx, kp = jax.random.split(key)
    x = jax.random.normal(kx, (batch, seq, dim), jnp.float32)
    w1, b1, w2, b2 = init_feed_forward_params(kp, dim, hidden_dim)

    out = feed_forward(x, w1, b1, w2, b2)
    out = jax.block_until_ready(out)

    ref = feed_forward_ref(x, w1, b1, w2, b2)
    assert out.shape == x.shape
    assert jnp.allclose(out, ref, atol=1e-5, rtol=1e-5), "mismatch vs reference"

    print("KERNEL_OK")
</pallas_src>

<mosaic_0001>
module attributes {stable_mosaic.version = 11 : i64} {
  func.func @_ffn_kernel(%arg0: i32, %arg1: i32, %arg2: memref<16x32xf32, #tpu.memory_space<vmem>>, %arg3: memref<32x64xf32, #tpu.memory_space<vmem>>, %arg4: memref<1x64xf32, #tpu.memory_space<vmem>>, %arg5: memref<64x32xf32, #tpu.memory_space<vmem>>, %arg6: memref<1x32xf32, #tpu.memory_space<vmem>>, %arg7: memref<16x32xf32, #tpu.memory_space<vmem>>, %arg8: memref<16x32xf32, #tpu.memory_space<vmem>>) attributes {dimension_semantics = [#tpu.dimension_semantics<parallel>, #tpu.dimension_semantics<arbitrary>], iteration_bounds = array<i64: 1, 1>, scalar_prefetch = 0 : i64, scratch_operands = 1 : i64, tpu.core_type = #tpu.core_type<tc>, window_params = [{transform_indices = @transform_0, window_bounds = array<i64: 16, 32>}, {transform_indices = @transform_1, window_bounds = array<i64: 32, 64>}, {transform_indices = @transform_2, window_bounds = array<i64: 1, 64>}, {transform_indices = @transform_3, window_bounds = array<i64: 64, 32>}, {pipeline_mode = #tpu.pipeline_mode<synchronous>, transform_indices = @transform_4, window_bounds = array<i64: 1, 32>}, {transform_indices = @transform_5, window_bounds = array<i64: 16, 32>}]} {
    %c0 = arith.constant 0 : index
    %c0_0 = arith.constant 0 : index
    %0 = vector.load %arg2[%c0, %c0_0] : memref<16x32xf32, #tpu.memory_space<vmem>>, vector<16x32xf32>
    %c0_1 = arith.constant 0 : index
    %c0_2 = arith.constant 0 : index
    %1 = vector.load %arg3[%c0_1, %c0_2] : memref<32x64xf32, #tpu.memory_space<vmem>>, vector<32x64xf32>
    %cst = arith.constant dense<0.000000e+00> : vector<16x64xf32>
    %2 = tpu.matmul %0, %1, %cst {dimension_numbers = #tpu.dot_dimension_numbers<[1], [0], [0], [1], [0, 0, 1, 1], [], []>} : vector<16x32xf32>, vector<32x64xf32>, vector<16x64xf32> -> vector<16x64xf32>
    %c0_3 = arith.constant 0 : index
    %c0_4 = arith.constant 0 : index
    %3 = vector.load %arg4[%c0_3, %c0_4] : memref<1x64xf32, #tpu.memory_space<vmem>>, vector<1x64xf32>
    %4 = vector.broadcast %3 : vector<1x64xf32> to vector<16x64xf32>
    %5 = arith.addf %2, %4 : vector<16x64xf32>
    %cst_5 = arith.constant 5.000000e-01 : f32
    %6 = vector.broadcast %cst_5 : f32 to vector<16x64xf32>
    %7 = arith.mulf %6, %5 : vector<16x64xf32>
    %cst_6 = arith.constant 0.707106769 : f32
    %8 = vector.broadcast %cst_6 : f32 to vector<16x64xf32>
    %9 = arith.mulf %5, %8 : vector<16x64xf32>
    %10 = math.erf %9 : vector<16x64xf32>
    %cst_7 = arith.constant 1.000000e+00 : f32
    %11 = vector.broadcast %cst_7 : f32 to vector<16x64xf32>
    %12 = arith.addf %11, %10 : vector<16x64xf32>
    %13 = arith.mulf %7, %12 : vector<16x64xf32>
    %c0_8 = arith.constant 0 : index
    %c0_9 = arith.constant 0 : index
    %14 = vector.load %arg5[%c0_8, %c0_9] : memref<64x32xf32, #tpu.memory_space<vmem>>, vector<64x32xf32>
    %cst_10 = arith.constant dense<0.000000e+00> : vector<16x32xf32>
    %15 = tpu.matmul %13, %14, %cst_10 {dimension_numbers = #tpu.dot_dimension_numbers<[1], [0], [0], [1], [0, 0, 1, 1], [], []>} : vector<16x64xf32>, vector<64x32xf32>, vector<16x32xf32> -> vector<16x32xf32>
    %c0_i32 = arith.constant 0 : i32
    %16 = arith.cmpi eq, %arg1, %c0_i32 : i32
    %17 = arith.extui %16 : i1 to i32
    %c0_i32_11 = arith.constant 0 : i32
    %18 = arith.cmpi ne, %17, %c0_i32_11 : i32
    scf.if %18 {
      %c0_16 = arith.constant 0 : index
      %c0_17 = arith.constant 0 : index
      %25 = vector.load %arg8[%c0_16, %c0_17] : memref<16x32xf32, #tpu.memory_space<vmem>>, vector<16x32xf32>
      tpu.vector_store %arg8[%c0_16, %c0_17], %15 {strides = array<i32>} : memref<16x32xf32, #tpu.memory_space<vmem>>, vector<16x32xf32>,
    } else {
    }
    %c0_i32_12 = arith.constant 0 : i32
    %19 = arith.cmpi sgt, %arg1, %c0_i32_12 : i32
    %20 = arith.extui %19 : i1 to i32
    %c0_i32_13 = arith.constant 0 : i32
    %21 = arith.cmpi ne, %20, %c0_i32_13 : i32
    scf.if %21 {
      %c0_16 = arith.constant 0 : index
      %c0_17 = arith.constant 0 : index
      %25 = vector.load %arg8[%c0_16, %c0_17] : memref<16x32xf32, #tpu.memory_space<vmem>>, vector<16x32xf32>
      %26 = arith.addf %25, %15 : vector<16x32xf32>
      %c0_18 = arith.constant 0 : index
      %c0_19 = arith.constant 0 : index
      %27 = vector.load %arg8[%c0_18, %c0_19] : memref<16x32xf32, #tpu.memory_space<vmem>>, vector<16x32xf32>
      tpu.vector_store %arg8[%c0_18, %c0_19], %26 {strides = array<i32>} : memref<16x32xf32, #tpu.memory_space<vmem>>, vector<16x32xf32>,
    } else {
    }
    %c0_i32_14 = arith.constant 0 : i32
    %22 = arith.cmpi eq, %arg1, %c0_i32_14 : i32
    %23 = arith.extui %22 : i1 to i32
    %c0_i32_15 = arith.constant 0 : i32
    %24 = arith.cmpi ne, %23, %c0_i32_15 : i32
    scf.if %24 {
      %c0_16 = arith.constant 0 : index
      %c0_17 = arith.constant 0 : index
      %25 = vector.load %arg8[%c0_16, %c0_17] : memref<16x32xf32, #tpu.memory_space<vmem>>, vector<16x32xf32>
      %c0_18 = arith.constant 0 : index
      %c0_19 = arith.constant 0 : index
      %26 = vector.load %arg6[%c0_18, %c0_19] : memref<1x32xf32, #tpu.memory_space<vmem>>, vector<1x32xf32>
      %27 = vector.broadcast %26 : vector<1x32xf32> to vector<16x32xf32>
      %28 = arith.addf %25, %27 : vector<16x32xf32>
      %c0_20 = arith.constant 0 : index
      %c0_21 = arith.constant 0 : index
      %29 = vector.load %arg7[%c0_20, %c0_21] : memref<16x32xf32, #tpu.memory_space<vmem>>, vector<16x32xf32>
      tpu.vector_store %arg7[%c0_20, %c0_21], %28 {strides = array<i32>} : memref<16x32xf32, #tpu.memory_space<vmem>>, vector<16x32xf32>,
    } else {
    }
    return
  }
  func.func @transform_0(%arg0: i32, %arg1: i32) -> (i32, i32) {
    %c0_i32 = arith.constant 0 : i32
    %c0_i32_0 = arith.constant 0 : i32
    return %arg0, %c0_i32 : i32, i32
  }
  func.func @transform_1(%arg0: i32, %arg1: i32) -> (i32, i32) {
    %c0_i32 = arith.constant 0 : i32
    %c0_i32_0 = arith.constant 0 : i32
    return %c0_i32, %arg1 : i32, i32
  }
  func.func @transform_2(%arg0: i32, %arg1: i32) -> (i32, i32) {
    %c0_i32 = arith.constant 0 : i32
    %c0_i32_0 = arith.constant 0 : i32
    return %c0_i32, %arg1 : i32, i32
  }
  func.func @transform_3(%arg0: i32, %arg1: i32) -> (i32, i32) {
    %c0_i32 = arith.constant 0 : i32
    %c0_i32_0 = arith.constant 0 : i32
    return %arg1, %c0_i32 : i32, i32
  }
  func.func @transform_4(%arg0: i32, %arg1: i32) -> (i32, i32) {
    %c0_i32 = arith.constant 0 : i32
    %c0_i32_0 = arith.constant 0 : i32
    %c0_i32_1 = arith.constant 0 : i32
    return %c0_i32, %c0_i32_0 : i32, i32
  }
  func.func @transform_5(%arg0: i32, %arg1: i32) -> (i32, i32) {
    %c0_i32 = arith.constant 0 : i32
    %c0_i32_0 = arith.constant 0 : i32
    return %arg0, %c0_i32 : i32, i32
  }
}

</mosaic_0001>

<bundles_post_ra>
// kernel: tpu_custom_call.1
= control target key start
LH: loop header
LB: loop body
LE: loop exit
PB: predicated region body
PF: predicated region fallthrough
CT: control target
= control target key end

     0   :  { %s407_s0 = inlined_call_operand.vmem [shape: f32[16,32], index: 0, kind: input, shape index: {}]   ;;  %s408_s1 = inlined_call_operand.vmem [shape: f32[32,64], index: 1, kind: input, shape index: {}]   ;;  %s409_s2 = inlined_call_operand.vmem [shape: f32[1,64], index: 2, kind: input, shape index: {}]   ;;  %s410_s3 = inlined_call_operand.vmem [shape: f32[64,32], index: 3, kind: input, shape index: {}]   ;;  %s411_s4 = inlined_call_operand.vmem [shape: f32[1,32], index: 4, kind: input, shape index: {}]   ;;  %s412_s5 = inlined_call_operand.hbm [shape: f32[16,32], index: 5, kind: output, shape index: {}]  }
   0x1   :  { %v26_v0 = vld [vmem:[%s408_s1 + $0x18] sm:$0xff]  ;;  %v25_v1 = vld [vmem:[%s408_s1 + $0x10] sm:$0xff]  ;;  %v24_v2 = vld [vmem:[%s408_s1 + $0x8] sm:$0xff] }
   0x2   :  { %50 = vmatpush.msra.mxu0 %v26_v0  ;;  %240 = vmatpush.msra.mxu3 %v26_v0 }
   0x3   :  { %10 = vsyncpa [#allocation4], 0  ;;  %v23_v3 = vld [vmem:[%s408_s1] sm:$0xff]  ;;  %vm31_vm0 = vcmask 261120   ;;  %v22_v5 = vld [vmem:[%s407_s0 + $0x8] sm:$0xff]  ;;  %vm157_vm9 = vcmask 523264  }
   0x4   :  { %51 = vmatpush.msra.mxu0 %v25_v1  ;;  %241 = vmatpush.msra.mxu3 %v25_v1  ;;  %v21_v4 = vld [vmem:[%s407_s0] sm:$0xff]  ;;  %v156_v14 = vld [vmem:[%s410_s3 + $0x38] sm:$0xff]  ;;  %v155_v18 = vld [vmem:[%s410_s3 + $0x30] sm:$0xff]  ;;  %s287_s21 = smov [#allocation3]   ;;  %s222_s25 = sshll.u32 %s412_s5, 4  ;;  %s223_s25 = int_to_ptr.hbm [resolvable:$true] %s222_s25 }
   0x5   :  { %v255_v6 = vld [vmem:[%s409_s2] ss:$0 sm:$0xff]  ;;  %172 = vmatpush.msra.mxu1 %v156_v14  ;;  %244 = vmatpush.msra.mxu2 %v156_v14  ;;  %v154_v22 = vld [vmem:[%s410_s3 + $0x28] sm:$0xff]  ;;  %v152_v31 = vld [vmem:[%s410_s3 + $0x18] sm:$0xff]  ;;  %s220_s22 = sshll.u32 %s287_s21, 4  ;;  %s289_s26 = smov 8   ;;  %s221_s22 = int_to_ptr.vmem [resolvable:$true] %s220_s22 }
   0x6   :  { %52 = vmatpush.msra.mxu0 %v24_v2  ;;  %242 = vmatpush.msra.mxu3 %v24_v2  ;;  %v153_v26 = vld [vmem:[%s410_s3 + $0x20] sm:$0xff]  ;;  %v151_v35 = vld [vmem:[%s410_s3 + $0x10] sm:$0xff]  ;;  %v150_v40 = vld [vmem:[%s410_s3 + $0x8] sm:$0xff] }
   0x7   :  { %173 = vmatpush.msra.mxu1 %v155_v18  ;;  %245 = vmatpush.msra.mxu2 %v155_v18  ;;  %v149_v42 = vld [vmem:[%s410_s3] sm:$0xff] }
   0x8   :  { %53 = vmatpush.msra.mxu0 %v23_v3  ;;  %243 = vmatpush.msra.mxu3 %v23_v3 }
   0x9   :  { %234 = vmatmul.msk.f32.vlgmr.msra.gmra.mxu0 %vm31_vm0, %v21_v4  ;;  %235 = vmatmul.msk.f32.vlgmr.msra.gmra.mxu3 %vm31_vm0, %v22_v5 }
   0xa   :  { %174 = vmatpush.msra.mxu1 %v154_v22  ;;  %246 = vmatpush.msra.mxu2 %v154_v22 }
   0xc   :  { %175 = vmatpush.msra.mxu1 %v153_v26  ;;  %247 = vmatpush.msra.mxu2 %v153_v26 }
   0xe   :  { %176 = vmatpush.msra.mxu1 %v152_v31  ;;  %248 = vmatpush.msra.mxu2 %v152_v31 }
  0x10   :  { %177 = vmatpush.msra.mxu1 %v151_v35  ;;  %249 = vmatpush.msra.mxu2 %v151_v35 }
  0x12   :  { %178 = vmatpush.msra.mxu1 %v150_v40  ;;  %250 = vmatpush.msra.mxu2 %v150_v40 }
  0x14   :  { %179 = vmatpush.msra.mxu1 %v149_v42  ;;  %251 = vmatpush.msra.mxu2 %v149_v42 }
  0x86   :  { %v55_v7 = vpop.f32.mrf.mxu0 }
  0x87   :  { %v343_v8 = vadd.f32 %v255_v6, %v55_v7 }
  0x89   :  { %v346_v9 = vmul.f32 0.70710677, %v343_v8  ;;  %v61_v26 = vmul.f32 0.5, %v343_v8  ;;  %v256_v8 = vld [vmem:[%s411_s4] ss:$0 sm:$0xff]  ;;  %s288_s4 = smov 128  }
  0x8b   :  { %v65_v10 = vmul.f32 %v346_v9, %v346_v9 }
  0x8c   :  { %v58_v11 = vpop.f32.mrf.mxu3 }
  0x8d   :  { %v350_v12 = vmin.f32 %v65_v10, 16.0  ;;  %v352_v13 = vadd.f32 %v255_v6, %v58_v11 }
  0x8f   :  { %v67_v15 = vmul.f32 2.1237322e-06, %v350_v12  ;;  %v78_v16 = vmul.f32 3.8918573e-05, %v350_v12  ;;  %v360_v17 = vmul.f32 0.70710677, %v352_v13 }
  0x91   :  { %v68_v19 = vadd.f32 0.00028619796, %v67_v15  ;;  %v79_v20 = vadd.f32 0.001143296, %v78_v16  ;;  %v105_v21 = vmul.f32 %v360_v17, %v360_v17 }
  0x93   :  { %v69_v23 = vmul.f32 %v68_v19, %v350_v12  ;;  %v80_v24 = vmul.f32 %v79_v20, %v350_v12  ;;  %v106_v25 = vmin.f32 %v105_v21, 16.0 }
  0x95   :  { %v70_v27 = vadd.f32 0.0036580483, %v69_v23  ;;  %v81_v28 = vadd.f32 0.014752088, %v80_v24  ;;  %v107_v29 = vmul.f32 2.1237322e-06, %v106_v25 }
  0x96   :  { %v118_v30 = vmul.f32 3.8918573e-05, %v106_v25 }
  0x97   :  { %v82_v32 = vmul.f32 %v81_v28, %v350_v12  ;;  %v108_v33 = vadd.f32 0.00028619796, %v107_v29  ;;  %v71_v37 = vmul.f32 %v70_v27, %v350_v12 }
  0x98   :  { %v119_v34 = vadd.f32 0.001143296, %v118_v30 }
  0x99   :  { %v83_v36 = vadd.f32 0.112945676, %v82_v32  ;;  %v109_v38 = vmul.f32 %v108_v33, %v106_v25  ;;  %v72_v46 = vadd.f32 0.05243302, %v71_v37  ;;  %v62_v33 = vmul.f32 0.5, %v352_v13 }
  0x9a   :  { %v120_v39 = vmul.f32 %v119_v34, %v106_v25 }
  0x9b   :  { %v84_v41 = vmul.f32 %v83_v36, %v350_v12  ;;  %v110_v45 = vadd.f32 0.0036580483, %v109_v38  ;;  %v73_v52 = vmul.f32 %v72_v46, %v350_v12 }
  0x9c   :  { %v121_v43 = vadd.f32 0.014752088, %v120_v39 }
  0x9d   :  { %v85_v44 = vadd.f32 0.4994258, %v84_v41  ;;  %v111_v51 = vmul.f32 %v110_v45, %v106_v25  ;;  %v74_v56 = vadd.f32 0.18741608, %v73_v52 }
  0x9e   :  { %v122_v47 = vmul.f32 %v121_v43, %v106_v25 }
  0x9f   :  { %v86_v48 = vmul.f32 %v85_v44, %v350_v12  ;;  %v112_v55 = vadd.f32 0.05243302, %v111_v51  ;;  %v75_v61 = vmul.f32 %v74_v56, %v350_v12 }
  0xa0   :  { %v123_v49 = vadd.f32 0.112945676, %v122_v47 }
  0xa1   :  { %v87_v50 = vadd.f32 1.0, %v86_v48  ;;  %v113_v60 = vmul.f32 %v112_v55, %v106_v25  ;;  %v76_v2 = vadd.f32 1.1283791, %v75_v61 }
  0xa2   :  { %v124_v53 = vmul.f32 %v123_v49, %v106_v25 }
  0xa3   :  { %257 = vrcp.f32 %v87_v50  ;;  %v99_v0 = vand.u32 2147483648, %v87_v50  ;;  %v114_v1 = vadd.f32 0.18741608, %v113_v60  ;;  %v97_v4 = vand.u32 2147483647, %v87_v50 }
  0xa4   :  { %v125_v54 = vadd.f32 0.4994258, %v124_v53  ;;  %vm93_vm2 = vweird.f32 %v87_v50  ;;  %v77_v14 = vmul.f32 %v76_v2, %v346_v9 }
  0xa5   :  { %v100_v7 = vor.u32 1.1754944e-38, %v99_v0  ;;  %v115_v10 = vmul.f32 %v114_v1, %v106_v25  ;;  %vm98_vm4 = vcmp.eq.f32.partialorder %v97_v4, 8.507059e+37 }
  0xa6   :  { %v126_v57 = vmul.f32 %v125_v54, %v106_v25 }
  0xa7   :  { %v116_v20 = vadd.f32 1.1283791, %v115_v10 }
  0xa8   :  { %v127_v58 = vadd.f32 1.0, %v126_v57 }
  0xa9   :  { %v258_v59 = vpop.eup %257  ;;  %v117_v9 = vmul.f32 %v116_v20, %v360_v17 }
  0xaa   :  { %v89_v62 = vmul.f32 %v258_v59, %v87_v50  ;;  %259 = vrcp.f32 %v127_v58  ;;  %vm94_vm1 = vweird.f32 %v258_v59  ;;  %v139_v19 = vand.u32 2147483648, %v127_v58 }
  0xab   :  { %vm95_vm3 = vmor %vm93_vm2, %vm94_vm1  ;;  %v137_v22 = vand.u32 2147483647, %v127_v58  ;;  %vm133_vm6 = vweird.f32 %v127_v58 }
  0xac   :  { %v90_v63 = vsub.f32 1.0, %v89_v62  ;;  %v140_v25 = vor.u32 1.1754944e-38, %v139_v19 }
  0xad   :  { %vm138_vm8 = vcmp.eq.f32.partialorder %v137_v22, 8.507059e+37 }
  0xae   :  { %v91_v3 = vmul.f32 %v258_v59, %v90_v63 }
  0xb0   :  { %v260_v5 = vpop.eup %259  ;;  %v92_v6 = vadd.f32 %v258_v59, %v91_v3 }
  0xb1   :  { %v129_v11 = vmul.f32 %v260_v5, %v127_v58  ;;  %vm134_vm5 = vweird.f32 %v260_v5 }
  0xb2   :  { %v96_v15 = vsel %vm95_vm3, %v258_v59, %v92_v6  ;;  %vm135_vm7 = vmor %vm133_vm6, %vm134_vm5 }
  0xb3   :  { %v101_v12 = vsel %vm98_vm4, %v100_v7, %v96_v15  ;;  %v130_v16 = vsub.f32 1.0, %v129_v11 }
  0xb4   :  { %v102_v18 = vmul.f32 %v101_v12, %v77_v14 }
  0xb5   :  { %v131_v21 = vmul.f32 %v260_v5, %v130_v16 }
  0xb6   :  { %v236_v23 = vclamps-f32 %v102_v18, 1.0 }
  0xb7   :  { %v132_v24 = vadd.f32 %v260_v5, %v131_v21 }
  0xb8   :  { %v145_v27 = vadd.f32 1.0, %v236_v23 }
  0xb9   :  { %v136_v28 = vsel %vm135_vm7, %v260_v5, %v132_v24 }
  0xba   :  { %v141_v29 = vsel %vm138_vm8, %v140_v25, %v136_v28  ;;  %v147_v30 = vmul.f32 %v145_v27, %v61_v26 }
  0xbb   :  { %v142_v31 = vmul.f32 %v141_v29, %v117_v9 }
  0xbc   :  { %238 = vmatmul.msk.f32.vlgmr.msra.gmra.mxu1 %vm157_vm9, %v147_v30 }
  0xbd   :  { %v237_v32 = vclamps-f32 %v142_v31, 1.0 }
  0xbf   :  { %v146_v34 = vadd.f32 1.0, %v237_v32 }
  0xc1   :  { %v148_v35 = vmul.f32 %v146_v34, %v62_v33 }
  0xc3   :  { %239 = vmatmul.msk.f32.vlgmr.msra.gmra.mxu2 %vm157_vm9, %v148_v35 }
 0x139   :  { %v181_v36 = vpop.f32.mrf.mxu1 }
 0x13a   :  { %191 = vst.msk [vmem:[#allocation2] sm:$0xff] %vm31_vm0, %v181_v36 }
 0x141   :  { %v206_v17 = vld [vmem:[#allocation2] sm:$0xff] }
 0x142   :  { %v212_v37 = vadd.f32 %v256_v8, %v206_v17 }
 0x144   :  { %214 = vst.msk [vmem:[#allocation3] sm:$0xff] %vm31_vm0, %v212_v37 }
 0x146   :  { %v184_v38 = vpop.f32.mrf.mxu2 }
 0x147   :  { %192 = vst.msk [vmem:[#allocation2 + $0x8] sm:$0xff] %vm31_vm0, %v184_v38 }
 0x14e   :  { %v207_v13 = vld [vmem:[#allocation2 + $0x8] sm:$0xff] }
 0x14f   :  { %v213_v39 = vadd.f32 %v256_v8, %v207_v13 }
 0x151   :  { %215 = vst.msk [vmem:[#allocation3 + $0x8] sm:$0xff] %vm31_vm0, %v213_v39 }
 0x152   :  { %228 = dma.vmem_to_hbm [thread:$0]  %s221_s22, 256, %s223_s25, [#allocation4], %s288_s4, %s288_s4, %s289_s26  }
 0x153   :  { %285 = dma.done.wait [#allocation4], 256  }
 0x154   :  { %286 = vsyncadd [#allocation4], 4294967040 }
 0x155   :  { %233 = vsyncpa [#allocation4], 1 }

</bundles_post_ra>
